<compile_context>
chip_gen: v5e
topology: v5e:2x2
jax: 0.10.0
libtpu: 0.0.40
codegen_flags: <defaults>
</compile_context>

<pallas_src>
import functools

import jax
import jax.numpy as jnp
from jax.experimental import pallas as pl
from jax.experimental.pallas import tpu as pltpu

INPUT_DIM = 3      # age, height_cm, income (after normalization)
LATENT_DIM = 2
HIDDEN = 128
LANE = 128                               # TPU lane width
OUT_PACK = 8                             # packed output rows: recon(3) | mu(2) | logvar(2) | pad(1)
SLAB_A_W = INPUT_DIM + LATENT_DIM + 3    # = 8 columns: w1T | b1 | w3T | b3 | bias-col


def _round_up(n, m):
    return ((n + m - 1) // m) * m


def vae_kernel(x_ref, eps_ref, wa_ref, wb_ref, out_ref):
    x = x_ref[...]          # [INPUT_DIM, TB]
    eps = eps_ref[...]      # [LATENT_DIM, TB]
    wa = wa_ref[...]        # [HIDDEN, SLAB_A_W]
    wb = wb_ref[...]        # [2*OUT_PACK, HIDDEN]

    # ---- unpack resident weight slabs (static slices of small VMEM-resident values) ----
    w1 = wa[:, 0:INPUT_DIM]                                             # [HIDDEN, 3]
    b1 = wa[:, INPUT_DIM:INPUT_DIM + 1]                                 # [HIDDEN, 1]
    w3 = wa[:, INPUT_DIM + 1:INPUT_DIM + 1 + LATENT_DIM]                # [HIDDEN, 2]
    b3 = wa[:, INPUT_DIM + 1 + LATENT_DIM:INPUT_DIM + 2 + LATENT_DIM]   # [HIDDEN, 1]
    bh = wa[0:OUT_PACK, SLAB_A_W - 1:SLAB_A_W]                          # [8, 1] head bias (rows 3:7 live)
    b4 = wa[OUT_PACK:2 * OUT_PACK, SLAB_A_W - 1:SLAB_A_W]               # [8, 1] decoder bias (rows 0:3 live)
    wh = wb[0:OUT_PACK, :]                                              # [8, HIDDEN] fused heads (rows 3:7 live)
    w4 = wb[OUT_PACK:2 * OUT_PACK, :]                                   # [8, HIDDEN] decoder out (rows 0:3 live)

    # ---- encode: h1 = relu(W1 @ x + b1), K=3 on the VPU (sublane reads of x) ----
    h1 = b1 + w1[:, 0:1] * x[0:1, :]
    for i in range(1, INPUT_DIM):
        h1 = h1 + w1[:, i:i + 1] * x[i:i + 1, :]
    h1 = jnp.maximum(h1, 0.0)                                           # [HIDDEN, TB]

    # Fused mu/logvar head: one K=128 MXU matmul; result is lane-dense over the batch.
    heads = jnp.dot(wh, h1, preferred_element_type=jnp.float32) + bh    # [8, TB], rows 0:3 & 7 are 0
    mu = heads[INPUT_DIM:INPUT_DIM + LATENT_DIM, :]                     # [2, TB]
    logvar = heads[INPUT_DIM + LATENT_DIM:INPUT_DIM + 2 * LATENT_DIM, :]

    # ---- reparameterize ----
    z = mu + eps * jnp.exp(0.5 * logvar)                                # [2, TB]

    # ---- decode: h3 = relu(W3 @ z + b3), K=2 on the VPU ----
    h3 = b3 + w3[:, 0:1] * z[0:1, :]
    for i in range(1, LATENT_DIM):
        h3 = h3 + w3[:, i:i + 1] * z[i:i + 1, :]
    h3 = jnp.maximum(h3, 0.0)                                           # [HIDDEN, TB]

    recon = jnp.dot(w4, h3, preferred_element_type=jnp.float32) + b4    # [8, TB], rows 3:8 are 0

    # Row-disjoint slabs -> packed output with a plain add (one lane-dense store).
    out_ref[...] = heads + recon


def init_linear(key, in_features, out_features):
    """PyTorch nn.Linear-style init: U[-1/sqrt(fan_in), 1/sqrt(fan_in)].

    Weight is returned as [in_features, out_features]; bias is [1, out_features].
    """
    k_w, k_b = jax.random.split(key)
    bound = 1.0 / jnp.sqrt(jnp.float32(in_features))
    w = jax.random.uniform(k_w, (in_features, out_features), jnp.float32, -bound, bound)
    b = jax.random.uniform(k_b, (1, out_features), jnp.float32, -bound, bound)
    return w, b


@functools.partial(jax.jit, static_argnames=("block_batch",))
def vae_forward(x, eps, params, block_batch=4096):
    (w1, b1), (w21, b21), (w22, b22), (w3, b3), (w4, b4) = params
    x = x.astype(jnp.float32)        # mirrors torch `x.float()`
    eps = eps.astype(jnp.float32)
    batch = x.shape[0]

    # ---- pack all weights/biases into two small resident slabs (2 constant streams) ----
    w1T = w1.T                                           # [HIDDEN, 3]
    b1c = b1.reshape(HIDDEN, 1)
    w3T = w3.T                                           # [HIDDEN, 2]
    b3c = b3.reshape(HIDDEN, 1)
    whT = jnp.concatenate([w21, w22], axis=1).T          # [4, HIDDEN]  (mu|logvar heads, fused)
    bhc = jnp.concatenate([b21, b22], axis=1).reshape(-1, 1)   # [4, 1]
    w4T = w4.T                                           # [3, HIDDEN]
    b4c = b4.reshape(-1, 1)                              # [3, 1]

    bias_col = jnp.zeros((HIDDEN, 1), jnp.float32)
    bias_col = bias_col.at[INPUT_DIM:INPUT_DIM + 2 * LATENT_DIM, :].set(bhc)   # head bias -> rows 3:7
    bias_col = bias_col.at[OUT_PACK:OUT_PACK + INPUT_DIM, :].set(b4c)          # decoder bias -> rows 8:11
    slab_a = jnp.concatenate([w1T, b1c, w3T, b3c, bias_col], axis=1)           # [HIDDEN, 8]

    slab_b = jnp.zeros((2 * OUT_PACK, HIDDEN), jnp.float32)
    slab_b = slab_b.at[INPUT_DIM:INPUT_DIM + 2 * LATENT_DIM, :].set(whT)       # heads  -> packed rows 3:7
    slab_b = slab_b.at[OUT_PACK:OUT_PACK + INPUT_DIM, :].set(w4T)              # recon  -> packed rows 0:3

    # ---- lane-dense, feature-major activations: [features, batch] ----
    tb = _round_up(max(1, min(block_batch, batch)), LANE)        # lane-aligned batch tile
    if batch >= 2 * LANE:
        tb = min(tb, _round_up((batch + 1) // 2, LANE))          # >=2 tiles -> both TCs on v7x
    padded = _round_up(batch, tb)
    n_tiles = padded // tb

    xT = jnp.pad(x, ((0, padded - batch), (0, 0))).T             # [INPUT_DIM, padded]
    epsT = jnp.pad(eps, ((0, padded - batch), (0, 0))).T         # [LATENT_DIM, padded]

    def act_spec(feat):      # activation tiles advance with the batch grid (lane dim = batch)
        return pl.BlockSpec((feat, tb), lambda i: (0, i))

    def const_spec(shape):   # weights: same block every step -> stays resident, no re-DMA
        return pl.BlockSpec(shape, lambda i: (0, 0))
    # TODO(synk): pipeline_mode=pl.Buffered(1) on the const specs would drop their (tiny)
    # second buffer; skipped since the constant index_map already avoids per-step re-DMA.

    out = pl.pallas_call(
        vae_kernel,
        out_shape=jax.ShapeDtypeStruct((OUT_PACK, padded), jnp.float32),
        grid_spec=pltpu.PrefetchScalarGridSpec(
            num_scalar_prefetch=0,
            grid=(n_tiles,),
            in_specs=[
                act_spec(INPUT_DIM),                    # xT
                act_spec(LATENT_DIM),                   # epsT
                const_spec((HIDDEN, SLAB_A_W)),         # slab_a
                const_spec((2 * OUT_PACK, HIDDEN)),     # slab_b
            ],
            out_specs=act_spec(OUT_PACK),
        ),
        compiler_params=pltpu.CompilerParams(
            dimension_semantics=("parallel",),          # batch tiles shard across TCs (v7x)
            vmem_limit_bytes=32 * 1024 * 1024,          # far above actual use; safe on all gens
        ),
    )(xT, epsT, slab_a, slab_b)

    recon = out[0:INPUT_DIM, :batch].T
    mu = out[INPUT_DIM:INPUT_DIM + LATENT_DIM, :batch].T
    logvar = out[INPUT_DIM + LATENT_DIM:INPUT_DIM + 2 * LATENT_DIM, :batch].T
    return recon, mu, logvar


def _reference(x, eps, params):
    (w1, b1), (w21, b21), (w22, b22), (w3, b3), (w4, b4) = params
    h1 = jnp.maximum(x @ w1 + b1, 0.0)
    mu = h1 @ w21 + b21
    lv = h1 @ w22 + b22
    z = mu + eps * jnp.exp(0.5 * lv)
    h3 = jnp.maximum(z @ w3 + b3, 0.0)
    return h3 @ w4 + b4, mu, lv


if __name__ == "__main__":
    key = jax.random.PRNGKey(0)
    k_x, k_eps, k1, k21, k22, k3, k4 = jax.random.split(key, 7)

    params = (
        init_linear(k1, INPUT_DIM, HIDDEN),     # fc1
        init_linear(k21, HIDDEN, LATENT_DIM),   # fc21
        init_linear(k22, HIDDEN, LATENT_DIM),   # fc22
        init_linear(k3, LATENT_DIM, HIDDEN),    # fc3
        init_linear(k4, HIDDEN, INPUT_DIM),     # fc4
    )

    ok = True
    # Small batch (single tile) and a mid-size batch (exercises the 2-tile / both-TC path).
    for batch in (8, 300):
        kx, ke = jax.random.split(jax.random.fold_in(k_x, batch))
        # Inputs stand in for z-normalized tabular rows (age, height, income).
        x = jax.random.normal(kx, (batch, INPUT_DIM), jnp.float32)
        # eps plays the role of torch.randn_like(std) — sampled once, deterministically.
        # TODO(synk): in-kernel sampling via pltpu.prng_random_bits would drop one input
        # stream; kept as an explicit input for deterministic parity with the reference.
        eps = jax.random.normal(ke, (batch, LATENT_DIM), jnp.float32)

        recon, mu, logvar = vae_forward(x, eps, params)
        jax.block_until_ready((recon, mu, logvar))

        recon_ref, mu_ref, lv_ref = _reference(x, eps, params)
        ok &= recon.shape == (batch, INPUT_DIM)
        ok &= mu.shape == (batch, LATENT_DIM) and logvar.shape == (batch, LATENT_DIM)
        ok &= bool(jnp.allclose(recon, recon_ref, atol=1e-4, rtol=1e-4))
        ok &= bool(jnp.allclose(mu, mu_ref, atol=1e-4, rtol=1e-4))
        ok &= bool(jnp.allclose(logvar, lv_ref, atol=1e-4, rtol=1e-4))

    assert ok
    print("KERNEL_OK")
</pallas_src>

<mosaic_0001>
module attributes {stable_mosaic.version = 11 : i64} {
  func.func @vae_kernel(%arg0: i32, %arg1: memref<3x128xf32, #tpu.memory_space<vmem>>, %arg2: memref<2x128xf32, #tpu.memory_space<vmem>>, %arg3: memref<128x8xf32, #tpu.memory_space<vmem>>, %arg4: memref<16x128xf32, #tpu.memory_space<vmem>>, %arg5: memref<8x128xf32, #tpu.memory_space<vmem>>) attributes {dimension_semantics = [#tpu.dimension_semantics<parallel>], iteration_bounds = array<i64: 1>, scalar_prefetch = 0 : i64, scratch_operands = 0 : i64, tpu.core_type = #tpu.core_type<tc>, window_params = [{transform_indices = @transform_0, window_bounds = array<i64: 3, 128>}, {transform_indices = @transform_1, window_bounds = array<i64: 2, 128>}, {pipeline_mode = #tpu.pipeline_mode<synchronous>, transform_indices = @transform_2, window_bounds = array<i64: 128, 8>}, {pipeline_mode = #tpu.pipeline_mode<synchronous>, transform_indices = @transform_3, window_bounds = array<i64: 16, 128>}, {transform_indices = @transform_4, window_bounds = array<i64: 8, 128>}]} {
    %c0 = arith.constant 0 : index
    %c0_0 = arith.constant 0 : index
    %0 = vector.load %arg1[%c0, %c0_0] : memref<3x128xf32, #tpu.memory_space<vmem>>, vector<3x128xf32>
    %c0_1 = arith.constant 0 : index
    %c0_2 = arith.constant 0 : index
    %1 = vector.load %arg2[%c0_1, %c0_2] : memref<2x128xf32, #tpu.memory_space<vmem>>, vector<2x128xf32>
    %c0_3 = arith.constant 0 : index
    %c0_4 = arith.constant 0 : index
    %2 = vector.load %arg3[%c0_3, %c0_4] : memref<128x8xf32, #tpu.memory_space<vmem>>, vector<128x8xf32>
    %c0_5 = arith.constant 0 : index
    %c0_6 = arith.constant 0 : index
    %3 = vector.load %arg4[%c0_5, %c0_6] : memref<16x128xf32, #tpu.memory_space<vmem>>, vector<16x128xf32>
    %4 = vector.extract_strided_slice %2 {offsets = [0, 0], sizes = [128, 3], strides = [1, 1]} : vector<128x8xf32> to vector<128x3xf32>
    %5 = vector.extract_strided_slice %2 {offsets = [0, 3], sizes = [128, 1], strides = [1, 1]} : vector<128x8xf32> to vector<128x1xf32>
    %6 = vector.extract_strided_slice %2 {offsets = [0, 4], sizes = [128, 2], strides = [1, 1]} : vector<128x8xf32> to vector<128x2xf32>
    %7 = vector.extract_strided_slice %2 {offsets = [0, 6], sizes = [128, 1], strides = [1, 1]} : vector<128x8xf32> to vector<128x1xf32>
    %8 = vector.extract_strided_slice %2 {offsets = [0, 7], sizes = [8, 1], strides = [1, 1]} : vector<128x8xf32> to vector<8x1xf32>
    %9 = vector.extract_strided_slice %2 {offsets = [8, 7], sizes = [8, 1], strides = [1, 1]} : vector<128x8xf32> to vector<8x1xf32>
    %10 = vector.extract_strided_slice %3 {offsets = [0, 0], sizes = [8, 128], strides = [1, 1]} : vector<16x128xf32> to vector<8x128xf32>
    %11 = vector.extract_strided_slice %3 {offsets = [8, 0], sizes = [8, 128], strides = [1, 1]} : vector<16x128xf32> to vector<8x128xf32>
    %12 = vector.extract_strided_slice %4 {offsets = [0, 0], sizes = [128, 1], strides = [1, 1]} : vector<128x3xf32> to vector<128x1xf32>
    %13 = vector.extract_strided_slice %0 {offsets = [0, 0], sizes = [1, 128], strides = [1, 1]} : vector<3x128xf32> to vector<1x128xf32>
    %14 = vector.broadcast %12 : vector<128x1xf32> to vector<128x128xf32>
    %15 = vector.broadcast %13 : vector<1x128xf32> to vector<128x128xf32>
    %16 = arith.mulf %14, %15 : vector<128x128xf32>
    %17 = vector.broadcast %5 : vector<128x1xf32> to vector<128x128xf32>
    %18 = arith.addf %17, %16 : vector<128x128xf32>
    %19 = vector.extract_strided_slice %4 {offsets = [0, 1], sizes = [128, 1], strides = [1, 1]} : vector<128x3xf32> to vector<128x1xf32>
    %20 = vector.extract_strided_slice %0 {offsets = [1, 0], sizes = [1, 128], strides = [1, 1]} : vector<3x128xf32> to vector<1x128xf32>
    %21 = vector.broadcast %19 : vector<128x1xf32> to vector<128x128xf32>
    %22 = vector.broadcast %20 : vector<1x128xf32> to vector<128x128xf32>
    %23 = arith.mulf %21, %22 : vector<128x128xf32>
    %24 = arith.addf %18, %23 : vector<128x128xf32>
    %25 = vector.extract_strided_slice %4 {offsets = [0, 2], sizes = [128, 1], strides = [1, 1]} : vector<128x3xf32> to vector<128x1xf32>
    %26 = vector.extract_strided_slice %0 {offsets = [2, 0], sizes = [1, 128], strides = [1, 1]} : vector<3x128xf32> to vector<1x128xf32>
    %27 = vector.broadcast %25 : vector<128x1xf32> to vector<128x128xf32>
    %28 = vector.broadcast %26 : vector<1x128xf32> to vector<128x128xf32>
    %29 = arith.mulf %27, %28 : vector<128x128xf32>
    %30 = arith.addf %24, %29 : vector<128x128xf32>
    %cst = arith.constant 0.000000e+00 : f32
    %31 = vector.broadcast %cst : f32 to vector<128x128xf32>
    %32 = arith.maximumf %30, %31 : vector<128x128xf32>
    %cst_7 = arith.constant dense<0.000000e+00> : vector<8x128xf32>
    %33 = tpu.matmul %10, %32, %cst_7 {dimension_numbers = #tpu.dot_dimension_numbers<[1], [0], [0], [1], [0, 0, 1, 1], [], []>} : vector<8x128xf32>, vector<128x128xf32>, vector<8x128xf32> -> vector<8x128xf32>
    %34 = vector.broadcast %8 : vector<8x1xf32> to vector<8x128xf32>
    %35 = arith.addf %33, %34 : vector<8x128xf32>
    %36 = vector.extract_strided_slice %35 {offsets = [3, 0], sizes = [2, 128], strides = [1, 1]} : vector<8x128xf32> to vector<2x128xf32>
    %37 = vector.extract_strided_slice %35 {offsets = [5, 0], sizes = [2, 128], strides = [1, 1]} : vector<8x128xf32> to vector<2x128xf32>
    %cst_8 = arith.constant 5.000000e-01 : f32
    %38 = vector.broadcast %cst_8 : f32 to vector<2x128xf32>
    %39 = arith.mulf %38, %37 : vector<2x128xf32>
    %40 = math.exp %39 : vector<2x128xf32>
    %41 = arith.mulf %1, %40 : vector<2x128xf32>
    %42 = arith.addf %36, %41 : vector<2x128xf32>
    %43 = vector.extract_strided_slice %6 {offsets = [0, 0], sizes = [128, 1], strides = [1, 1]} : vector<128x2xf32> to vector<128x1xf32>
    %44 = vector.extract_strided_slice %42 {offsets = [0, 0], sizes = [1, 128], strides = [1, 1]} : vector<2x128xf32> to vector<1x128xf32>
    %45 = vector.broadcast %43 : vector<128x1xf32> to vector<128x128xf32>
    %46 = vector.broadcast %44 : vector<1x128xf32> to vector<128x128xf32>
    %47 = arith.mulf %45, %46 : vector<128x128xf32>
    %48 = vector.broadcast %7 : vector<128x1xf32> to vector<128x128xf32>
    %49 = arith.addf %48, %47 : vector<128x128xf32>
    %50 = vector.extract_strided_slice %6 {offsets = [0, 1], sizes = [128, 1], strides = [1, 1]} : vector<128x2xf32> to vector<128x1xf32>
    %51 = vector.extract_strided_slice %42 {offsets = [1, 0], sizes = [1, 128], strides = [1, 1]} : vector<2x128xf32> to vector<1x128xf32>
    %52 = vector.broadcast %50 : vector<128x1xf32> to vector<128x128xf32>
    %53 = vector.broadcast %51 : vector<1x128xf32> to vector<128x128xf32>
    %54 = arith.mulf %52, %53 : vector<128x128xf32>
    %55 = arith.addf %49, %54 : vector<128x128xf32>
    %cst_9 = arith.constant 0.000000e+00 : f32
    %56 = vector.broadcast %cst_9 : f32 to vector<128x128xf32>
    %57 = arith.maximumf %55, %56 : vector<128x128xf32>
    %cst_10 = arith.constant dense<0.000000e+00> : vector<8x128xf32>
    %58 = tpu.matmul %11, %57, %cst_10 {dimension_numbers = #tpu.dot_dimension_numbers<[1], [0], [0], [1], [0, 0, 1, 1], [], []>} : vector<8x128xf32>, vector<128x128xf32>, vector<8x128xf32> -> vector<8x128xf32>
    %59 = vector.broadcast %9 : vector<8x1xf32> to vector<8x128xf32>
    %60 = arith.addf %58, %59 : vector<8x128xf32>
    %61 = arith.addf %35, %60 : vector<8x128xf32>
    %c0_11 = arith.constant 0 : index
    %c0_12 = arith.constant 0 : index
    %62 = vector.load %arg5[%c0_11, %c0_12] : memref<8x128xf32, #tpu.memory_space<vmem>>, vector<8x128xf32>
    tpu.vector_store %arg5[%c0_11, %c0_12], %61 {strides = array<i32>} : memref<8x128xf32, #tpu.memory_space<vmem>>, vector<8x128xf32>,
    return
  }
  func.func @transform_0(%arg0: i32) -> (i32, i32) {
    %c0_i32 = arith.constant 0 : i32
    %c0_i32_0 = arith.constant 0 : i32
    return %c0_i32, %arg0 : i32, i32
  }
  func.func @transform_1(%arg0: i32) -> (i32, i32) {
    %c0_i32 = arith.constant 0 : i32
    %c0_i32_0 = arith.constant 0 : i32
    return %c0_i32, %arg0 : i32, i32
  }
  func.func @transform_2(%arg0: i32) -> (i32, i32) {
    %c0_i32 = arith.constant 0 : i32
    %c0_i32_0 = arith.constant 0 : i32
    %c0_i32_1 = arith.constant 0 : i32
    return %c0_i32, %c0_i32_0 : i32, i32
  }
  func.func @transform_3(%arg0: i32) -> (i32, i32) {
    %c0_i32 = arith.constant 0 : i32
    %c0_i32_0 = arith.constant 0 : i32
    %c0_i32_1 = arith.constant 0 : i32
    return %c0_i32, %c0_i32_0 : i32, i32
  }
  func.func @transform_4(%arg0: i32) -> (i32, i32) {
    %c0_i32 = arith.constant 0 : i32
    %c0_i32_0 = arith.constant 0 : i32
    return %c0_i32, %arg0 : i32, i32
  }
}

</mosaic_0001>

<bundles_post_ra>
// kernel: vae_forward.1
= control target key start
LH: loop header
LB: loop body
LE: loop exit
PB: predicated region body
PF: predicated region fallthrough
CT: control target
= control target key end

     0   :  { %v807_v0 = vmov 0   ;;  %v808_v17 = vmov 3   ;;  %v809_v18 = vmov 1   ;;  %v810_v29 = vmov 2   ;;  %s1327_s2 = inlined_call_operand.vmem [shape: f32[128,8], index: 2, kind: input, shape index: {}]   ;;  %s1328_s0 = inlined_call_operand.vmem [shape: f32[3,128], index: 0, kind: input, shape index: {}]   ;;  %s1329_s3 = inlined_call_operand.vmem [shape: f32[16,128], index: 3, kind: input, shape index: {}]   ;;  %s1330_s1 = inlined_call_operand.vmem [shape: f32[2,128], index: 1, kind: input, shape index: {}]   ;;  %s1331_s4 = inlined_call_operand.vmem [shape: f32[8,128], index: 4, kind: output, shape index: {}]  }
   0x1   :  { %773 = vset.pattern.permute.xlu2 %v807_v0  ;;  %772 = vset.pattern.permute.xlu1 %v807_v0  ;;  %v843_v1 = vld [vmem:[%s1327_s2 + $0x20] sm:$0xff]  ;;  %v848_v2 = vld [vmem:[%s1327_s2 + $0x10] sm:$0xff]  ;;  %v861_v4 = vld [vmem:[%s1327_s2 + $0x28] sm:$0xff]  ;;  %v811_v61 = vmov 4  }
   0x2   :  { %v853_v3 = vld [vmem:[%s1327_s2] sm:$0xff]  ;;  %771 = vset.pattern.permute.xlu0 %v807_v0  ;;  %59 = vperm.xlu2 %773, %v843_v1   ;;  %v866_v5 = vld [vmem:[%s1327_s2 + $0x18] sm:$0xff]  ;;  %v871_v6 = vld [vmem:[%s1327_s2 + $0x8] sm:$0xff] }
   0x3   :  { %49 = vperm.xlu1 %772, %v848_v2   ;;  %39 = vperm.xlu0 %771, %v853_v3   ;;  %v879_v7 = vld [vmem:[%s1327_s2 + $0x40] sm:$0xff]  ;;  %v884_v8 = vld [vmem:[%s1327_s2 + $0x38] sm:$0xff]  ;;  %v889_v9 = vld [vmem:[%s1327_s2 + $0x30] sm:$0xff] }
   0x4   :  { %v897_v10 = vld [vmem:[%s1327_s2 + $0x58] sm:$0xff]  ;;  %v902_v11 = vld [vmem:[%s1327_s2 + $0x50] sm:$0xff]  ;;  %v907_v12 = vld [vmem:[%s1327_s2 + $0x48] sm:$0xff] }
   0x5   :  { %v915_v13 = vld [vmem:[%s1327_s2 + $0x70] sm:$0xff]  ;;  %v920_v14 = vld [vmem:[%s1327_s2 + $0x68] sm:$0xff]  ;;  %v925_v15 = vld [vmem:[%s1327_s2 + $0x60] sm:$0xff] }
   0x6   :  { %v933_v16 = vld [vmem:[%s1327_s2 + $0x78] sm:$0xff]  ;;  %v978_v28 = vld [vmem:[%s1328_s0] sm:$0x7] }
   0x7   :  { %v982_v30 = vperm.slane %v978_v28, 0 }
   0xa   :  { %64 = vperm.xlu2 %773, %v861_v4  }
   0xb   :  { %54 = vperm.xlu1 %772, %v866_v5   ;;  %44 = vperm.xlu0 %771, %v871_v6  }
  0x12   :  { %79 = vperm.xlu2 %773, %v879_v7  }
  0x13   :  { %74 = vperm.xlu1 %772, %v884_v8   ;;  %69 = vperm.xlu0 %771, %v889_v9  }
  0x1a   :  { %94 = vperm.xlu2 %773, %v897_v10  }
  0x1b   :  { %89 = vperm.xlu1 %772, %v902_v11   ;;  %84 = vperm.xlu0 %771, %v907_v12  }
  0x22   :  { %109 = vperm.xlu2 %773, %v915_v13  }
  0x23   :  { %104 = vperm.xlu1 %772, %v920_v14   ;;  %99 = vperm.xlu0 %771, %v925_v15  }
  0x2a   :  { %775 = vset.pattern.permute.xlu2 %v808_v17 }
  0x2b   :  { %774 = vset.pattern.permute.xlu1 %v808_v17  ;;  %114 = vperm.xlu0 %771, %v933_v16  }
  0x2c   :  { %139 = vperm.xlu2 %775, %v871_v6   ;;  %135 = vperm.xlu1 %774, %v853_v3  }
  0x33   :  { %776 = vset.pattern.permute.xlu0 %v808_v17 }
  0x34   :  { %151 = vperm.xlu2 %775, %v843_v1   ;;  %147 = vperm.xlu1 %774, %v866_v5  }
  0x35   :  { %143 = vperm.xlu0 %776, %v848_v2  }
  0x3c   :  { %159 = vperm.xlu2 %775, %v889_v9   ;;  %155 = vperm.xlu1 %774, %v861_v4  }
  0x3d   :  { %163 = vperm.xlu0 %776, %v884_v8  }
  0x44   :  { %171 = vperm.xlu2 %775, %v907_v12   ;;  %167 = vperm.xlu1 %774, %v879_v7  }
  0x45   :  { %175 = vperm.xlu0 %776, %v902_v11  }
  0x4c   :  { %183 = vperm.xlu2 %775, %v925_v15   ;;  %179 = vperm.xlu1 %774, %v897_v10  }
  0x4d   :  { %187 = vperm.xlu0 %776, %v920_v14  }
  0x54   :  { %195 = vperm.xlu2 %775, %v933_v16   ;;  %191 = vperm.xlu1 %774, %v915_v13  }
  0x55   :  { %777 = vset.pattern.permute.xlu0 %v809_v18 }
  0x56   :  { %215 = vperm.xlu0 %777, %v853_v3  }
  0x5c   :  { %779 = vset.pattern.permute.xlu2 %v809_v18  ;;  %778 = vset.pattern.permute.xlu1 %v809_v18  ;;  %v60_v19 = vpop.permute.xlu2 %59 }
  0x5d   :  { %223 = vperm.xlu2 %779, %v848_v2   ;;  %219 = vperm.xlu1 %778, %v871_v6   ;;  %v122_v36 = vmul.f32 %v982_v30, %v60_v19 }
  0x5e   :  { %235 = vperm.xlu0 %777, %v861_v4  }
  0x64   :  { %v956_v20 = vpop.permute.xlu2 %64 }
  0x65   :  { %231 = vperm.xlu2 %779, %v843_v1   ;;  %227 = vperm.xlu1 %778, %v866_v5   ;;  %v123_v63 = vmul.f32 %v982_v30, %v956_v20 }
  0x66   :  { %247 = vperm.xlu0 %777, %v879_v7  }
  0x6c   :  { %v961_v21 = vpop.permute.xlu2 %79 }
  0x6d   :  { %243 = vperm.xlu2 %779, %v884_v8   ;;  %239 = vperm.xlu1 %778, %v889_v9   ;;  %v126_v20 = vmul.f32 %v982_v30, %v961_v21 }
  0x6e   :  { %259 = vperm.xlu0 %777, %v897_v10  }
  0x74   :  { %v966_v22 = vpop.permute.xlu2 %94 }
  0x75   :  { %v50_v23 = vpop.permute.xlu1 %49  ;;  %255 = vperm.xlu2 %779, %v902_v11   ;;  %251 = vperm.xlu1 %778, %v907_v12   ;;  %v40_v24 = vpop.permute.xlu0 %39 }
  0x76   :  { %271 = vperm.xlu0 %777, %v915_v13   ;;  %v118_v46 = vmul.f32 %v982_v30, %v40_v24  ;;  %v120_v55 = vmul.f32 %v982_v30, %v50_v23 }
  0x7c   :  { %v971_v25 = vpop.permute.xlu2 %109 }
  0x7d   :  { %v55_v26 = vpop.permute.xlu1 %54  ;;  %267 = vperm.xlu2 %779, %v920_v14   ;;  %263 = vperm.xlu1 %778, %v925_v15   ;;  %v45_v27 = vpop.permute.xlu0 %44 }
  0x7e   :  { %781 = vset.pattern.permute.xlu0 %v810_v29  ;;  %v119_v31 = vmul.f32 %v982_v30, %v45_v27  ;;  %v121_v53 = vmul.f32 %v982_v30, %v55_v26  ;;  %v1036_v26 = vperm.slane %v978_v28, 1 }
  0x7f   :  { %372 = vperm.xlu0 %781, %v933_v16  }
  0x85   :  { %v75_v32 = vpop.permute.xlu1 %74  ;;  %780 = vset.pattern.permute.xlu2 %v810_v29  ;;  %275 = vperm.xlu1 %778, %v933_v16   ;;  %v70_v33 = vpop.permute.xlu0 %69 }
  0x86   :  { %v140_v34 = vpop.permute.xlu2 %139  ;;  %312 = vperm.xlu2 %780, %v853_v3   ;;  %v124_v41 = vmul.f32 %v982_v30, %v70_v33  ;;  %v125_v0 = vmul.f32 %v982_v30, %v75_v32 }
  0x87   :  { %v987_v35 = vadd.f32 %v140_v34, %v119_v31  ;;  %352 = vperm.xlu0 %781, %v902_v11   ;;  %v812_v31 = vmov 7  }
  0x8d   :  { %v90_v37 = vpop.permute.xlu1 %89  ;;  %782 = vset.pattern.permute.xlu1 %v810_v29  ;;  %v85_v38 = vpop.permute.xlu0 %84 }
  0x8e   :  { %v152_v39 = vpop.permute.xlu2 %151  ;;  %364 = vperm.xlu2 %780, %v920_v14   ;;  %368 = vperm.xlu1 %782, %v915_v13   ;;  %v127_v47 = vmul.f32 %v982_v30, %v85_v38  ;;  %v128_v27 = vmul.f32 %v982_v30, %v90_v37  ;;  %v129_v37 = vmul.f32 %v982_v30, %v966_v22 }
  0x8f   :  { %v993_v40 = vadd.f32 %v152_v39, %v122_v36  ;;  %340 = vperm.xlu0 %781, %v884_v8  }
  0x95   :  { %v997_v42 = vpop.permute.xlu1 %104  ;;  %v100_v43 = vpop.permute.xlu0 %99 }
  0x96   :  { %v160_v44 = vpop.permute.xlu2 %159  ;;  %356 = vperm.xlu2 %780, %v897_v10   ;;  %360 = vperm.xlu1 %782, %v925_v15   ;;  %v130_v54 = vmul.f32 %v982_v30, %v100_v43 }
  0x97   :  { %v1001_v45 = vadd.f32 %v160_v44, %v124_v41  ;;  %328 = vperm.xlu0 %781, %v843_v1  }
  0x9d   :  { %v1006_v48 = vpop.permute.xlu0 %114 }
  0x9e   :  { %v172_v49 = vpop.permute.xlu2 %171  ;;  %344 = vperm.xlu2 %780, %v879_v7   ;;  %348 = vperm.xlu1 %782, %v907_v12   ;;  %v136_v50 = vpop.permute.xlu1 %135 }
  0x9f   :  { %v1010_v51 = vadd.f32 %v172_v49, %v127_v47  ;;  %v198_v52 = vadd.f32 %v136_v50, %v118_v46  ;;  %316 = vperm.xlu0 %781, %v871_v6  }
  0xa6   :  { %v184_v56 = vpop.permute.xlu2 %183  ;;  %332 = vperm.xlu2 %780, %v861_v4   ;;  %336 = vperm.xlu1 %782, %v889_v9   ;;  %v148_v57 = vpop.permute.xlu1 %147 }
  0xa7   :  { %v1018_v58 = vadd.f32 %v184_v56, %v130_v54  ;;  %v1020_v59 = vadd.f32 %v148_v57, %v121_v53  ;;  %v144_v60 = vpop.permute.xlu0 %143  ;;  %785 = vset.pattern.permute.xlu0 %v811_v61 }
  0xa8   :  { %v200_v62 = vadd.f32 %v144_v60, %v120_v55  ;;  %464 = vperm.xlu0 %785, %v871_v6   ;;  %v813_v60 = vmov 5  }
  0xae   :  { %v1026_v17 = vpop.permute.xlu2 %195  ;;  %320 = vperm.xlu2 %780, %v848_v2   ;;  %324 = vperm.xlu1 %782, %v866_v5   ;;  %v156_v18 = vpop.permute.xlu1 %155 }
  0xaf   :  { %v1030_v19 = vadd.f32 %v156_v18, %v123_v63  ;;  %v164_v23 = vpop.permute.xlu0 %163 }
  0xb0   :  { %v1032_v24 = vadd.f32 %v164_v23, %v125_v0  ;;  %484 = vperm.xlu0 %785, %v889_v9  }
  0xb6   :  { %v168_v29 = vpop.permute.xlu1 %167  ;;  %783 = vset.pattern.permute.xlu1 %v812_v31  ;;  %784 = vset.pattern.permute.xlu2 %v811_v61 }
  0xb7   :  { %v1042_v32 = vadd.f32 %v168_v29, %v126_v20  ;;  %v176_v33 = vpop.permute.xlu0 %175  ;;  %v224_v34 = vpop.permute.xlu2 %223  ;;  %425 = vperm.xlu1 %783, %v853_v3   ;;  %460 = vperm.xlu2 %784, %v853_v3   ;;  %v814_v20 = vmov 6  }
  0xb8   :  { %v1046_v36 = vadd.f32 %v176_v33, %v128_v27  ;;  %v281_v38 = vmul.f32 %v1036_v26, %v224_v34  ;;  %496 = vperm.xlu0 %785, %v907_v12  }
  0xba   :  { %v1050_v21 = vadd.f32 %v281_v38, %v200_v62  ;;  %v1119_v38 = vperm.slane %v978_v28, 2  ;;  %v131_v28 = vmul.f32 %v982_v30, %v997_v42 }
  0xbe   :  { %v180_v39 = vpop.permute.xlu1 %179 }
  0xbf   :  { %v1054_v41 = vadd.f32 %v180_v39, %v129_v37  ;;  %v1056_v43 = vpop.permute.xlu0 %187  ;;  %v232_v44 = vpop.permute.xlu2 %231  ;;  %786 = vset.pattern.permute.xlu1 %v811_v61  ;;  %472 = vperm.xlu2 %784, %v866_v5  }
  0xc0   :  { %v283_v46 = vmul.f32 %v1036_v26, %v232_v44  ;;  %468 = vperm.xlu1 %786, %v848_v2   ;;  %508 = vperm.xlu0 %785, %v925_v15  }
  0xc2   :  { %v1063_v47 = vadd.f32 %v283_v46, %v993_v40 }
  0xc6   :  { %v1065_v49 = vpop.permute.xlu1 %191 }
  0xc7   :  { %480 = vperm.xlu2 %784, %v861_v4   ;;  %v1073_v54 = vpop.permute.xlu2 %243 }
  0xc8   :  { %v216_v22 = vpop.permute.xlu0 %215  ;;  %476 = vperm.xlu1 %786, %v843_v1   ;;  %520 = vperm.xlu0 %785, %v933_v16  }
  0xc9   :  { %v279_v50 = vmul.f32 %v1036_v26, %v216_v22 }
  0xcb   :  { %v1071_v53 = vadd.f32 %v279_v50, %v198_v52 }
  0xcf   :  { %v220_v55 = vpop.permute.xlu1 %219  ;;  %492 = vperm.xlu2 %784, %v879_v7   ;;  %v1085_v52 = vpop.permute.xlu2 %255 }
  0xd0   :  { %v280_v40 = vmul.f32 %v1036_v26, %v220_v55  ;;  %v1077_v56 = vpop.permute.xlu0 %235  ;;  %488 = vperm.xlu1 %786, %v884_v8   ;;  %791 = vset.pattern.permute.xlu0 %v813_v60 }
  0xd1   :  { %669 = vperm.xlu0 %791, %v925_v15  }
  0xd2   :  { %v1081_v57 = vadd.f32 %v280_v40, %v987_v35 }
  0xd7   :  { %v228_v61 = vpop.permute.xlu1 %227  ;;  %504 = vperm.xlu2 %784, %v897_v10   ;;  %v268_v18 = vpop.permute.xlu2 %267 }
  0xd8   :  { %v282_v62 = vmul.f32 %v1036_v26, %v228_v61  ;;  %v1089_v63 = vpop.permute.xlu0 %247  ;;  %500 = vperm.xlu1 %786, %v902_v11   ;;  %v292_v55 = vmul.f32 %v1036_v26, %v268_v18 }
  0xd9   :  { %649 = vperm.xlu0 %791, %v884_v8  }
  0xda   :  { %v1093_v0 = vadd.f32 %v282_v62, %v1020_v59 }
  0xdf   :  { %v1096_v35 = vpop.permute.xlu1 %239  ;;  %516 = vperm.xlu2 %784, %v915_v13  }
  0xe0   :  { %512 = vperm.xlu1 %786, %v920_v14   ;;  %v260_v23 = vpop.permute.xlu0 %259  ;;  %v1108_v59 = vpop.permute.xlu2 %312 }
  0xe1   :  { %796 = vset.pattern.permute.xlu0 %v814_v20 }
  0xe2   :  { %597 = vperm.xlu0 %796, %v915_v13  }
  0xe7   :  { %v1102_v27 = vpop.permute.xlu1 %251  ;;  %788 = vset.pattern.permute.xlu2 %v813_v60 }
  0xe8   :  { %787 = vset.pattern.permute.xlu1 %v814_v20  ;;  %681 = vperm.xlu2 %788, %v933_v16   ;;  %v272_v29 = vpop.permute.xlu0 %271  ;;  %v365_v34 = vpop.permute.xlu2 %364 }
  0xe9   :  { %601 = vperm.xlu1 %787, %v933_v16   ;;  %v133_v16 = vmul.f32 %v982_v30, %v1006_v48  ;;  %v132_v48 = vmul.f32 %v982_v30, %v971_v25  ;;  %v389_v62 = vmul.f32 %v1119_v38, %v365_v34 }
  0xea   :  { %577 = vperm.xlu0 %796, %v907_v12  }
  0xeb   :  { %v213_v44 = vadd.f32 %v1026_v17, %v133_v16  ;;  %v293_v17 = vmul.f32 %v1036_v26, %v272_v29 }
  0xef   :  { %v264_v33 = vpop.permute.xlu1 %263 }
  0xf0   :  { %790 = vset.pattern.permute.xlu2 %v814_v20  ;;  %v357_v40 = vpop.permute.xlu2 %356  ;;  %v291_v34 = vmul.f32 %v1036_v26, %v264_v33 }
  0xf1   :  { %789 = vset.pattern.permute.xlu1 %v813_v60  ;;  %593 = vperm.xlu2 %790, %v920_v14   ;;  %v373_v37 = vpop.permute.xlu0 %372 }
  0xf2   :  { %677 = vperm.xlu1 %789, %v915_v13   ;;  %557 = vperm.xlu0 %796, %v843_v1   ;;  %v391_v46 = vmul.f32 %v1119_v38, %v373_v37 }
  0xf7   :  { %v276_v39 = vpop.permute.xlu1 %275 }
  0xf8   :  { %v294_v22 = vmul.f32 %v1036_v26, %v276_v39  ;;  %v289_v39 = vmul.f32 %v1036_v26, %v1085_v52 }
  0xf9   :  { %589 = vperm.xlu2 %790, %v925_v15   ;;  %v212_v15 = vadd.f32 %v1065_v49, %v132_v48  ;;  %v353_v25 = vpop.permute.xlu0 %352  ;;  %v290_v49 = vmul.f32 %v1036_v26, %v260_v23  ;;  %v307_v23 = vadd.f32 %v291_v34, %v1018_v58  ;;  %v288_v58 = vmul.f32 %v1036_v26, %v1102_v27 }
  0xfa   :  { %673 = vperm.xlu1 %789, %v920_v14   ;;  %v310_v13 = vadd.f32 %v294_v22, %v213_v44  ;;  %801 = vset.pattern.permute.xlu0 %v813_v60  ;;  %v211_v14 = vadd.f32 %v1056_v43, %v131_v28  ;;  %v387_v44 = vmul.f32 %v1119_v38, %v357_v40  ;;  %v345_v22 = vpop.permute.xlu2 %344 }
  0xfb   :  { %629 = vperm.xlu0 %801, %v848_v2   ;;  %v309_v42 = vadd.f32 %v293_v17, %v212_v15  ;;  %v386_v33 = vmul.f32 %v1119_v38, %v353_v25  ;;  %v305_v52 = vadd.f32 %v289_v39, %v1046_v36  ;;  %v286_v40 = vmul.f32 %v1036_v26, %v1073_v54 }
  0xfc   :  { %v407_v50 = vadd.f32 %v391_v46, %v310_v13  ;;  %v308_v30 = vadd.f32 %v292_v55, %v211_v14  ;;  %v306_v13 = vadd.f32 %v290_v49, %v1054_v41  ;;  %v287_v55 = vmul.f32 %v1036_v26, %v1089_v63 }
  0xfd   :  { %v402_v17 = vadd.f32 %v386_v33, %v305_v52  ;;  %v304_v15 = vadd.f32 %v288_v58, %v1010_v51  ;;  %v302_v54 = vadd.f32 %v286_v40, %v1032_v24 }
  0xfe   :  { %v423_v61 = vmax.f32 %v407_v50, 0.0  ;;  %v405_v29 = vadd.f32 %v389_v62, %v308_v30  ;;  %v403_v28 = vadd.f32 %v387_v44, %v306_v13  ;;  %v303_v36 = vadd.f32 %v287_v55, %v1042_v32 }
  0xff   :  { %v418_v27 = vmax.f32 %v402_v17, 0.0  ;;  %v284_v32 = vmul.f32 %v1036_v26, %v1077_v56 }
 0x100   :  { %v369_v16 = vpop.permute.xlu1 %368  ;;  %428 = vmatpush.msra.mxu0 %v423_v61  ;;  %v421_v46 = vmax.f32 %v405_v29, 0.0  ;;  %v384_v61 = vmul.f32 %v1119_v38, %v345_v22  ;;  %v419_v14 = vmax.f32 %v403_v28, 0.0 }
 0x101   :  { %v390_v18 = vmul.f32 %v1119_v38, %v369_v16  ;;  %793 = vset.pattern.permute.xlu2 %v813_v60  ;;  %v300_v49 = vadd.f32 %v284_v32, %v1030_v19 }
 0x102   :  { %792 = vset.pattern.permute.xlu1 %v814_v20  ;;  %665 = vperm.xlu2 %793, %v897_v10   ;;  %v333_v25 = vpop.permute.xlu2 %332  ;;  %v400_v30 = vadd.f32 %v384_v61, %v303_v36 }
 0x103   :  { %585 = vperm.xlu1 %792, %v897_v10   ;;  %v406_v43 = vadd.f32 %v390_v18, %v309_v42  ;;  %804 = vset.pattern.permute.xlu0 %v812_v31  ;;  %v341_v31 = vpop.permute.xlu0 %340  ;;  %v285_v42 = vmul.f32 %v1036_v26, %v1096_v35  ;;  %v381_v24 = vmul.f32 %v1119_v38, %v333_v25 }
 0x104   :  { %734 = vperm.xlu0 %804, %v871_v6   ;;  %v383_v62 = vmul.f32 %v1119_v38, %v341_v31  ;;  %v416_v29 = vmax.f32 %v400_v30, 0.0 }
 0x105   :  { %v422_v37 = vmax.f32 %v406_v43, 0.0  ;;  %v397_v26 = vadd.f32 %v381_v24, %v300_v49 }
 0x106   :  { %v399_v43 = vadd.f32 %v383_v62, %v302_v54 }
 0x107   :  { %429 = vmatpush.msra.mxu0 %v422_v37  ;;  %v301_v37 = vadd.f32 %v285_v42, %v1001_v45 }
 0x108   :  { %v361_v10 = vpop.permute.xlu1 %360  ;;  %v415_v39 = vmax.f32 %v399_v43, 0.0 }
 0x109   :  { %v388_v50 = vmul.f32 %v1119_v38, %v361_v10  ;;  %430 = vmatpush.msra.mxu0 %v421_v46  ;;  %v413_v10 = vmax.f32 %v397_v26, 0.0 }
 0x10a   :  { %661 = vperm.xlu2 %793, %v902_v11   ;;  %v321_v35 = vpop.permute.xlu2 %320 }
 0x10b   :  { %581 = vperm.xlu1 %792, %v902_v11   ;;  %v404_v48 = vadd.f32 %v388_v50, %v307_v23  ;;  %v329_v51 = vpop.permute.xlu0 %328  ;;  %v378_v45 = vmul.f32 %v1119_v38, %v321_v35 }
 0x10c   :  { %v380_v56 = vmul.f32 %v1119_v38, %v329_v51 }
 0x10d   :  { %v420_v41 = vmax.f32 %v404_v48, 0.0 }
 0x10e   :  { %v396_v19 = vadd.f32 %v380_v56, %v1063_v47  ;;  %v394_v47 = vadd.f32 %v378_v45, %v1050_v21  ;;  %v35_v21 = vld [vmem:[%s1329_s3] sm:$0xff] }
 0x10f   :  { %431 = vmatpush.msra.mxu0 %v420_v41 }
 0x110   :  { %v349_v11 = vpop.permute.xlu1 %348  ;;  %v412_v50 = vmax.f32 %v396_v19, 0.0  ;;  %v410_v48 = vmax.f32 %v394_v47, 0.0 }
 0x111   :  { %v385_v63 = vmul.f32 %v1119_v38, %v349_v11  ;;  %432 = vmatpush.msra.mxu0 %v419_v14 }
 0x112   :  { %795 = vset.pattern.permute.xlu2 %v814_v20 }
 0x113   :  { %433 = vmatpush.msra.mxu0 %v418_v27  ;;  %794 = vset.pattern.permute.xlu1 %v813_v60  ;;  %v401_v16 = vadd.f32 %v385_v63, %v304_v15  ;;  %v317_v22 = vpop.permute.xlu0 %316 }
 0x114   :  { %657 = vperm.xlu1 %794, %v907_v12   ;;  %573 = vperm.xlu2 %795, %v879_v7   ;;  %v377_v23 = vmul.f32 %v1119_v38, %v317_v22 }
 0x115   :  { %v417_v18 = vmax.f32 %v401_v16, 0.0 }
 0x116   :  { %v393_v52 = vadd.f32 %v377_v23, %v1081_v57 }
 0x117   :  { %434 = vmatpush.msra.mxu0 %v417_v18 }
 0x118   :  { %v337_v34 = vpop.permute.xlu1 %336 }
 0x119   :  { %v382_v12 = vmul.f32 %v1119_v38, %v337_v34  ;;  %435 = vmatpush.msra.mxu0 %v416_v29 }
 0x11b   :  { %436 = vmatpush.msra.mxu0 %v415_v39  ;;  %v398_v44 = vadd.f32 %v382_v12, %v301_v37  ;;  %v1228_v36 = vpop.permute.xlu0 %464  ;;  %v18_v39 = vld [vmem:[%s1330_s1] sm:$0x3] }
 0x11c   :  { %653 = vperm.xlu1 %794, %v879_v7   ;;  %569 = vperm.xlu2 %795, %v884_v8   ;;  %v376_v7 = vmul.f32 %v1119_v38, %v1108_v59 }
 0x11d   :  { %v414_v46 = vmax.f32 %v398_v44, 0.0 }
 0x11e   :  { %v392_v59 = vadd.f32 %v376_v7, %v1071_v53 }
 0x11f   :  { %437 = vmatpush.msra.mxu0 %v414_v46 }
 0x120   :  { %v325_v13 = vpop.permute.xlu1 %324 }
 0x121   :  { %v379_v33 = vmul.f32 %v1119_v38, %v325_v13  ;;  %438 = vmatpush.msra.mxu0 %v413_v10  ;;  %v409_v38 = vmax.f32 %v393_v52, 0.0 }
 0x123   :  { %439 = vmatpush.msra.mxu0 %v412_v50  ;;  %v395_v8 = vadd.f32 %v379_v33, %v1093_v0  ;;  %v408_v0 = vmax.f32 %v392_v59, 0.0  ;;  %v1230_v11 = vpop.permute.xlu0 %484 }
 0x124   :  { %797 = vset.pattern.permute.xlu1 %v814_v20  ;;  %798 = vset.pattern.permute.xlu2 %v813_v60 }
 0x125   :  { %v411_v31 = vmax.f32 %v395_v8, 0.0  ;;  %565 = vperm.xlu1 %797, %v889_v9   ;;  %645 = vperm.xlu2 %798, %v889_v9   ;;  %v1202_v9 = vpop.permute.xlu2 %460 }
 0x127   :  { %440 = vmatpush.msra.mxu0 %v411_v31 }
 0x129   :  { %441 = vmatpush.msra.mxu0 %v410_v48  ;;  %v426_v28 = vpop.permute.xlu1 %425 }
 0x12b   :  { %442 = vmatpush.msra.mxu0 %v409_v38  ;;  %v497_v63 = vpop.permute.xlu0 %496 }
 0x12d   :  { %443 = vmatpush.msra.mxu0 %v408_v0  ;;  %561 = vperm.xlu1 %797, %v861_v4   ;;  %v1210_v57 = vpop.permute.xlu2 %472 }
 0x12e   :  { %444 = vmatmul.f32.vlgmr.msra.gmra.mxu0 %v35_v21  ;;  %641 = vperm.xlu2 %798, %v861_v4  }
 0x132   :  { %v1207_v53 = vpop.permute.xlu1 %468 }
 0x135   :  { %799 = vset.pattern.permute.xlu1 %v813_v60  ;;  %v1216_v4 = vpop.permute.xlu2 %480 }
 0x136   :  { %637 = vperm.xlu1 %799, %v843_v1   ;;  %800 = vset.pattern.permute.xlu2 %v814_v20 }
 0x137   :  { %553 = vperm.xlu2 %800, %v866_v5  }
 0x13a   :  { %v1214_v55 = vpop.permute.xlu1 %476 }
 0x13d   :  { %v1224_v58 = vpop.permute.xlu2 %492 }
 0x13e   :  { %633 = vperm.xlu1 %799, %v866_v5  }
 0x13f   :  { %549 = vperm.xlu2 %800, %v848_v2  }
 0x142   :  { %v1222_v1 = vpop.permute.xlu1 %488 }
 0x145   :  { %v505_v5 = vpop.permute.xlu2 %504 }
 0x146   :  { %802 = vset.pattern.permute.xlu1 %v814_v20 }
 0x147   :  { %545 = vperm.xlu1 %802, %v871_v6   ;;  %803 = vset.pattern.permute.xlu2 %v813_v60 }
 0x148   :  { %625 = vperm.xlu2 %803, %v871_v6  }
 0x14a   :  { %v501_v2 = vpop.permute.xlu1 %500 }
 0x14d   :  { %v517_v17 = vpop.permute.xlu2 %516 }
 0x14f   :  { %541 = vperm.xlu1 %802, %v853_v3  }
 0x150   :  { %621 = vperm.xlu2 %803, %v853_v3   ;;  %v509_v3 = vpop.permute.xlu0 %508 }
 0x152   :  { %v513_v41 = vpop.permute.xlu1 %512 }
 0x155   :  { %v682_v20 = vpop.permute.xlu2 %681 }
 0x158   :  { %v521_v30 = vpop.permute.xlu0 %520 }
 0x15b   :  { %v602_v40 = vpop.permute.xlu1 %601 }
 0x15d   :  { %v594_v14 = vpop.permute.xlu2 %593 }
 0x160   :  { %v670_v42 = vpop.permute.xlu0 %669 }
 0x164   :  { %v678_v61 = vpop.permute.xlu1 %677 }
 0x165   :  { %v590_v6 = vpop.permute.xlu2 %589 }
 0x168   :  { %v1249_v37 = vpop.permute.xlu0 %649 }
 0x16c   :  { %v674_v60 = vpop.permute.xlu1 %673 }
 0x16d   :  { %v666_v62 = vpop.permute.xlu2 %665 }
 0x170   :  { %v598_v19 = vpop.permute.xlu0 %597 }
 0x175   :  { %v586_v15 = vpop.permute.xlu1 %585  ;;  %v1232_v25 = vpop.permute.xlu2 %661 }
 0x178   :  { %v578_v52 = vpop.permute.xlu0 %577 }
 0x17d   :  { %v582_v27 = vpop.permute.xlu1 %581  ;;  %v1236_v16 = vpop.permute.xlu2 %573 }
 0x185   :  { %v1240_v51 = vpop.permute.xlu2 %569 }
 0x186   :  { %v1234_v54 = vpop.permute.xlu1 %657 }
 0x18d   :  { %v1247_v49 = vpop.permute.xlu2 %645 }
 0x18e   :  { %v1238_v32 = vpop.permute.xlu1 %653 }
 0x195   :  { %v1256_v44 = vpop.permute.xlu2 %641 }
 0x197   :  { %v1244_v24 = vpop.permute.xlu1 %565 }
 0x19d   :  { %v1263_v13 = vpop.permute.xlu2 %553 }
 0x19f   :  { %v1251_v56 = vpop.permute.xlu1 %561 }
 0x1a8   :  { %v1259_v45 = vpop.permute.xlu1 %637 }
 0x1ab   :  { %v445_v18 = vpop.f32.mrf.mxu0 }
 0x1ac   :  { %v1242_v43 = vadd.f32 %v445_v18, %v426_v28 }
 0x1ae   :  { %v448_v29 = vmul.f32 0.5, %v1242_v43 }
 0x1b0   :  { %v449_v34 = vmul.f32 1.442695, %v448_v29 }
 0x1b2   :  { %805 = vpow2.f32 %v449_v34 }
 0x1b8   :  { %v806_v12 = vpop.eup %805 }
 0x1b9   :  { %v452_v26 = vrot.slane %v806_v12, 5  ;;  %v550_v12 = vpop.permute.xlu2 %549 }
 0x1bb   :  { %v454_v35 = vmul.f32 %v452_v26, %v18_v39 }
 0x1bd   :  { %v456_v46 = vrot.slane %v454_v35, 5 }
 0x1bf   :  { %v458_v22 = vadd.f32 %v456_v46, %v1242_v43  ;;  %v558_v46 = vpop.permute.xlu0 %557 }
 0x1c1   :  { %v1261_v10 = vperm.slane %v458_v22, 3  ;;  %v1265_v23 = vperm.slane %v458_v22, 4 }
 0x1c3   :  { %v539_v33 = vmul.f32 %v1261_v10, %v521_v30  ;;  %v538_v50 = vmul.f32 %v1261_v10, %v517_v17  ;;  %v537_v7 = vmul.f32 %v1261_v10, %v513_v41  ;;  %v700_v47 = vmul.f32 %v1265_v23, %v682_v20 }
 0x1c4   :  { %v536_v31 = vmul.f32 %v1261_v10, %v509_v3  ;;  %v699_v59 = vmul.f32 %v1265_v23, %v678_v61  ;;  %v535_v0 = vmul.f32 %v1261_v10, %v505_v5  ;;  %v698_v28 = vmul.f32 %v1265_v23, %v674_v60 }
 0x1c5   :  { %v619_v8 = vadd.f32 %v602_v40, %v539_v33  ;;  %v618_v48 = vadd.f32 %v598_v19, %v538_v50  ;;  %v617_v38 = vadd.f32 %v594_v14, %v537_v7  ;;  %v534_v17 = vmul.f32 %v1261_v10, %v501_v2  ;;  %v634_v40 = vpop.permute.xlu1 %633 }
 0x1c6   :  { %v616_v30 = vadd.f32 %v590_v6, %v536_v31  ;;  %v533_v41 = vmul.f32 %v1261_v10, %v497_v63  ;;  %v697_v3 = vmul.f32 %v1265_v23, %v670_v42  ;;  %v615_v34 = vadd.f32 %v586_v15, %v535_v0 }
 0x1c7   :  { %v716_v21 = vadd.f32 %v700_v47, %v619_v8  ;;  %v715_v18 = vadd.f32 %v699_v59, %v618_v48  ;;  %v714_v29 = vadd.f32 %v698_v28, %v617_v38  ;;  %v696_v61 = vmul.f32 %v1265_v23, %v666_v62  ;;  %v626_v47 = vpop.permute.xlu2 %625 }
 0x1c8   :  { %v713_v14 = vadd.f32 %v697_v3, %v616_v30  ;;  %v614_v39 = vadd.f32 %v582_v27, %v534_v17  ;;  %v532_v60 = vmul.f32 %v1261_v10, %v1224_v58  ;;  %v613_v2 = vadd.f32 %v578_v52, %v533_v41 }
 0x1c9   :  { %v732_v20 = vmax.f32 %v716_v21, 0.0  ;;  %v731_v5 = vmax.f32 %v715_v18, 0.0  ;;  %v730_v6 = vmax.f32 %v714_v29, 0.0  ;;  %v712_v63 = vadd.f32 %v696_v61, %v615_v34  ;;  %v630_v21 = vpop.permute.xlu0 %629 }
 0x1ca   :  { %v695_v26 = vmul.f32 %v1265_v23, %v1232_v25  ;;  %v531_v15 = vmul.f32 %v1261_v10, %v1222_v1  ;;  %v694_v62 = vmul.f32 %v1265_v23, %v1234_v54  ;;  %v729_v42 = vmax.f32 %v713_v14, 0.0 }
 0x1cb   :  { %737 = vmatpush.msra.mxu1 %v732_v20  ;;  %v612_v27 = vadd.f32 %v1236_v16, %v532_v60  ;;  %v530_v58 = vmul.f32 %v1261_v10, %v1230_v11  ;;  %v728_v22 = vmax.f32 %v712_v63, 0.0  ;;  %v693_v25 = vmul.f32 %v1265_v23, %v1238_v32  ;;  %v36_v60 = vld [vmem:[%s1329_s3 + $0x8] sm:$0xff] }
 0x1cc   :  { %v711_v35 = vadd.f32 %v695_v26, %v614_v39  ;;  %v710_v19 = vadd.f32 %v694_v62, %v613_v2  ;;  %v611_v1 = vadd.f32 %v1240_v51, %v531_v15  ;;  %v529_v54 = vmul.f32 %v1261_v10, %v1216_v4 }
 0x1cd   :  { %738 = vmatpush.msra.mxu1 %v731_v5  ;;  %v528_v33 = vmul.f32 %v1261_v10, %v1214_v55  ;;  %v546_v50 = vpop.permute.xlu1 %545  ;;  %v709_v7 = vadd.f32 %v693_v25, %v612_v27  ;;  %v692_v11 = vmul.f32 %v1265_v23, %v1249_v37  ;;  %v610_v8 = vadd.f32 %v1244_v24, %v530_v58 }
 0x1ce   :  { %v727_v16 = vmax.f32 %v711_v35, 0.0  ;;  %v726_v31 = vmax.f32 %v710_v19, 0.0  ;;  %v691_v51 = vmul.f32 %v1265_v23, %v1247_v49  ;;  %v609_v4 = vadd.f32 %v1251_v56, %v529_v54 }
 0x1cf   :  { %739 = vmatpush.msra.mxu1 %v730_v6  ;;  %v708_v32 = vadd.f32 %v692_v11, %v611_v1  ;;  %v527_v55 = vmul.f32 %v1261_v10, %v1210_v57  ;;  %v526_v52 = vmul.f32 %v1261_v10, %v1207_v53  ;;  %v608_v48 = vadd.f32 %v558_v46, %v528_v33  ;;  %v622_v29 = vpop.permute.xlu2 %621 }
 0x1d0   :  { %v725_v37 = vmax.f32 %v709_v7, 0.0  ;;  %v707_v59 = vadd.f32 %v691_v51, %v610_v8  ;;  %v690_v24 = vmul.f32 %v1265_v23, %v1256_v44  ;;  %v689_v38 = vmul.f32 %v1265_v23, %v1259_v45 }
 0x1d1   :  { %740 = vmatpush.msra.mxu1 %v729_v42  ;;  %v525_v49 = vmul.f32 %v1261_v10, %v1228_v36  ;;  %v724_v56 = vmax.f32 %v708_v32, 0.0  ;;  %v607_v57 = vadd.f32 %v1263_v13, %v527_v55  ;;  %v688_v53 = vmul.f32 %v1265_v23, %v634_v40  ;;  %v735_v2 = vpop.permute.xlu0 %734 }
 0x1d2   :  { %v706_v0 = vadd.f32 %v690_v24, %v609_v4  ;;  %v606_v28 = vadd.f32 %v550_v12, %v526_v52  ;;  %v524_v30 = vmul.f32 %v1261_v10, %v1202_v9  ;;  %v723_v44 = vmax.f32 %v707_v59, 0.0 }
 0x1d3   :  { %741 = vmatpush.msra.mxu1 %v728_v22  ;;  %v705_v17 = vadd.f32 %v689_v38, %v608_v48  ;;  %v605_v45 = vadd.f32 %v546_v50, %v525_v49  ;;  %v687_v18 = vmul.f32 %v1265_v23, %v630_v21  ;;  %v704_v20 = vadd.f32 %v688_v53, %v607_v57 }
 0x1d4   :  { %v722_v36 = vmax.f32 %v706_v0, 0.0  ;;  %v686_v13 = vmul.f32 %v1265_v23, %v626_v47  ;;  %v685_v12 = vmul.f32 %v1265_v23, %v622_v29 }
 0x1d5   :  { %742 = vmatpush.msra.mxu1 %v727_v16  ;;  %v542_v41 = vpop.permute.xlu1 %541  ;;  %v721_v40 = vmax.f32 %v705_v17, 0.0  ;;  %v703_v34 = vadd.f32 %v687_v18, %v606_v28  ;;  %v720_v9 = vmax.f32 %v704_v20, 0.0 }
 0x1d6   :  { %v604_v3 = vadd.f32 %v542_v41, %v524_v30  ;;  %v702_v10 = vadd.f32 %v686_v13, %v605_v45 }
 0x1d7   :  { %743 = vmatpush.msra.mxu1 %v726_v31  ;;  %v719_v61 = vmax.f32 %v703_v34, 0.0 }
 0x1d8   :  { %v701_v5 = vadd.f32 %v685_v12, %v604_v3  ;;  %v718_v14 = vmax.f32 %v702_v10, 0.0 }
 0x1d9   :  { %744 = vmatpush.msra.mxu1 %v725_v37 }
 0x1da   :  { %v717_v39 = vmax.f32 %v701_v5, 0.0 }
 0x1db   :  { %745 = vmatpush.msra.mxu1 %v724_v56 }
 0x1dd   :  { %746 = vmatpush.msra.mxu1 %v723_v44 }
 0x1df   :  { %747 = vmatpush.msra.mxu1 %v722_v36 }
 0x1e1   :  { %748 = vmatpush.msra.mxu1 %v721_v40 }
 0x1e3   :  { %749 = vmatpush.msra.mxu1 %v720_v9 }
 0x1e5   :  { %750 = vmatpush.msra.mxu1 %v719_v61 }
 0x1e7   :  { %751 = vmatpush.msra.mxu1 %v718_v14 }
 0x1e9   :  { %752 = vmatpush.msra.mxu1 %v717_v39 }
 0x1ea   :  { %753 = vmatmul.f32.vlgmr.msra.gmra.mxu1 %v36_v60 }
 0x267   :  { %v754_v6 = vpop.f32.mrf.mxu1 }
 0x268   :  { %v755_v63 = vadd.f32 %v754_v6, %v735_v2 }
 0x26a   :  { %v757_v23 = vadd.f32 %v755_v63, %v1242_v43 }
 0x26c   :  { %758 = vst [vmem:[%s1331_s4] sm:$0xff] %v757_v23 }

</bundles_post_ra>
